<compile_context>
chip_gen: v7x
topology: tpu7x:2x2x1
jax: 0.10.0
libtpu: 0.0.40
codegen_flags: <defaults>
</compile_context>

<pallas_src>
import functools
import math

import jax
import jax.numpy as jnp
from jax import lax
from jax.experimental import pallas as pl
from jax.experimental.pallas import tpu as pltpu


def _round_up(x, m):
    return ((x + m - 1) // m) * m


# ---------------------------------------------------------------------------
# Kernel
# ---------------------------------------------------------------------------
def _self_attention_kernel(x_ref, wqkv_ref, bqkv_ref, wo_ref, bo_ref, o_ref,
                           *, bblk, seq, d_model, d_pad, compute_dtype):
    rows = bblk * seq

    # (bblk, S, D) -> (bblk*S, D).  Free view when S % 8 == 0 (documented below).
    x = x_ref[...].reshape(rows, d_model).astype(compute_dtype)

    # Fused QKV projection: (rows, D) @ (D, 3*D_pad), f32 accumulation.
    # The three output segments are 128-lane aligned; the attention scale is
    # already folded into the Q segment of the weight and bias.
    qkv = jnp.dot(x, wqkv_ref[...], preferred_element_type=jnp.float32)
    qkv = (qkv + bqkv_ref[...]).reshape(bblk, seq, 3 * d_pad)

    q = qkv[:, :, 0 * d_pad:1 * d_pad]          # lane-aligned free views
    k = qkv[:, :, 1 * d_pad:2 * d_pad]
    v = qkv[:, :, 2 * d_pad:3 * d_pad]

    # scores: contract over the padded feature dim (padded columns are zero in
    # both q and k, so the result is exact), batch over bblk -> no k transpose.
    scores = lax.dot_general(
        q.astype(compute_dtype), k.astype(compute_dtype),
        dimension_numbers=(((2,), (2,)), ((0,), (0,))),
        preferred_element_type=jnp.float32)                    # (bblk, S, S)

    # Numerically-stable softmax in f32; denominator reciprocal on the EUP.
    m = jnp.max(scores, axis=-1, keepdims=True)
    e = jnp.exp(scores - m)
    p = e * pl.reciprocal(jnp.sum(e, axis=-1, keepdims=True), approx=True)

    y = lax.dot_general(
        p.astype(compute_dtype), v.astype(compute_dtype),
        dimension_numbers=(((2,), (1,)), ((0,), (0,))),
        preferred_element_type=jnp.float32)                    # (bblk, S, D_pad)

    # Output projection on the lane-padded width -> unmasked lane-dense store.
    out = jnp.dot(y.reshape(rows, d_pad).astype(compute_dtype), wo_ref[...],
                  preferred_element_type=jnp.float32) + bo_ref[...]
    o_ref[...] = out.reshape(bblk, seq, d_pad).astype(o_ref.dtype)


# ---------------------------------------------------------------------------
# One-time parameter preparation (hoisted out of the per-call path)
# ---------------------------------------------------------------------------
def prepare_params(params, *, compute_dtype=jnp.float32):
    """Fuse/transpose/lane-pad PyTorch-style (out,in) weights once."""
    D = params["q_w"].shape[0]
    D_pad = _round_up(D, 128)
    scale = 1.0 / math.sqrt(float(D))

    wqkv = jnp.zeros((D, 3 * D_pad), jnp.float32)
    wqkv = wqkv.at[:, 0 * D_pad:0 * D_pad + D].set(params["q_w"].T * scale)
    wqkv = wqkv.at[:, 1 * D_pad:1 * D_pad + D].set(params["k_w"].T)
    wqkv = wqkv.at[:, 2 * D_pad:2 * D_pad + D].set(params["v_w"].T)

    bqkv = jnp.zeros((1, 3 * D_pad), jnp.float32)
    bqkv = bqkv.at[:, 0 * D_pad:0 * D_pad + D].set(params["q_b"] * scale)
    bqkv = bqkv.at[:, 1 * D_pad:1 * D_pad + D].set(params["k_b"])
    bqkv = bqkv.at[:, 2 * D_pad:2 * D_pad + D].set(params["v_b"])

    wo = jnp.zeros((D_pad, D_pad), jnp.float32).at[:D, :D].set(params["o_w"].T)
    bo = jnp.zeros((1, D_pad), jnp.float32).at[:, :D].set(params["o_b"])

    return {
        "wqkv": wqkv.astype(compute_dtype),
        "bqkv": bqkv,                         # biases stay f32
        "wo": wo.astype(compute_dtype),
        "bo": bo,
        "d_model": D,
        "d_pad": D_pad,
    }


# ---------------------------------------------------------------------------
# Blocking / VMEM sizing
# ---------------------------------------------------------------------------
def _pick_batch_block(batch, seq, d_model, d_pad, x_bytes,
                      budget_bytes=20 * 1024 * 1024):
    """Largest divisor of `batch` whose per-step live VMEM (including the full
    (bblk,S,S) softmax working set) stays under `budget_bytes`, while keeping
    >= 2 grid steps when possible so both v7x TensorCores get work."""
    def live_bytes(bb):
        rows = bb * seq
        scores = 3 * bb * seq * seq * 4              # scores, exp, probs (f32)
        qkv = rows * 3 * d_pad * 4
        y_out = 2 * rows * d_pad * 4
        io = 2 * rows * d_model * x_bytes + 2 * rows * d_pad * 4
        return scores + qkv + y_out + io

    max_bblk = batch // 2 if batch >= 2 else 1
    best = 1
    for bb in range(1, batch + 1):
        if batch % bb == 0 and bb <= max_bblk and live_bytes(bb) <= budget_bytes:
            best = bb
    return best


# ---------------------------------------------------------------------------
# Forward wrapper
# ---------------------------------------------------------------------------
def _forward(x, wqkv, bqkv, wo, bo, *, d_model, d_pad, compute_dtype,
             return_padded):
    B, S, D = x.shape
    assert D == d_model, "x feature dim must match the prepared parameters"
    # NOTE: S should be a multiple of 8 (16 for bf16 compute) so the in-kernel
    # (bblk,S,D)<->(rows,D) reshapes stay free views; other S still runs.

    # bf16 path: cast once in the (jitted) wrapper -> halves x's HBM->VMEM bytes.
    if compute_dtype == jnp.bfloat16:
        x = x.astype(jnp.bfloat16)

    x_bytes = x.dtype.itemsize
    w_bytes = jnp.dtype(compute_dtype).itemsize
    bblk = _pick_batch_block(B, S, D, d_pad, x_bytes)
    rows = bblk * S

    est = (2 * bblk * S * D * x_bytes            # x block (double-buffered)
           + 2 * bblk * S * d_pad * 4            # out block (double-buffered)
           + (D * 3 * d_pad + d_pad * d_pad) * w_bytes + 4 * d_pad * 4
           + 3 * bblk * S * S * 4                # scores / exp / probs
           + rows * 3 * d_pad * 4 + 2 * rows * d_pad * 4)
    vmem_limit = int(min(64 << 20, max(32 << 20, 2 * est)))

    kernel = functools.partial(
        _self_attention_kernel, bblk=bblk, seq=S, d_model=D, d_pad=d_pad,
        compute_dtype=compute_dtype)

    weight_pm = pl.Buffered(1)    # grid-invariant inputs: single-buffer in VMEM
    out = pl.pallas_call(
        kernel,
        out_shape=jax.ShapeDtypeStruct((B, S, d_pad), jnp.float32),
        grid_spec=pltpu.PrefetchScalarGridSpec(
            num_scalar_prefetch=0,
            grid=(B // bblk,),
            in_specs=[
                pl.BlockSpec((bblk, S, D), lambda b: (b, 0, 0)),       # x
                pl.BlockSpec((D, 3 * d_pad), lambda b: (0, 0),
                             pipeline_mode=weight_pm),                 # Wqkv
                pl.BlockSpec((1, 3 * d_pad), lambda b: (0, 0),
                             pipeline_mode=weight_pm),                 # bqkv
                pl.BlockSpec((d_pad, d_pad), lambda b: (0, 0),
                             pipeline_mode=weight_pm),                 # Wout
                pl.BlockSpec((1, d_pad), lambda b: (0, 0),
                             pipeline_mode=weight_pm),                 # bout
            ],
            out_specs=pl.BlockSpec((bblk, S, d_pad), lambda b: (b, 0, 0)),
        ),
        compiler_params=pltpu.CompilerParams(
            dimension_semantics=("parallel",),
            vmem_limit_bytes=vmem_limit),
    )(x, wqkv, bqkv, wo, bo)

    if d_pad != D and not return_padded:
        # Extra HBM pass; pass return_padded=True and consume the padded output
        # downstream to avoid it.
        out = out[..., :D]
    return out


def make_self_attention(params, *, compute_dtype=jnp.float32,
                        return_padded=False):
    """Prepare fused weights once and return a jitted forward: x -> attention(x)."""
    prepped = prepare_params(params, compute_dtype=compute_dtype)
    fwd = functools.partial(
        _forward,
        d_model=prepped["d_model"], d_pad=prepped["d_pad"],
        compute_dtype=compute_dtype, return_padded=return_padded)

    @jax.jit
    def apply(x):
        return fwd(x, prepped["wqkv"], prepped["bqkv"],
                   prepped["wo"], prepped["bo"])

    return apply


# ---------------------------------------------------------------------------
# Pure-JAX reference (mirrors the PyTorch module exactly, mask/dropout = None)
# ---------------------------------------------------------------------------
def _reference(x, params):
    def lin(z, w, b):
        return z @ w.T + b
    q = lin(x, params["q_w"], params["q_b"])
    k = lin(x, params["k_w"], params["k_b"])
    v = lin(x, params["v_w"], params["v_b"])
    d_k = q.shape[-1]
    scores = jnp.einsum("bqd,bkd->bqk", q, k) / math.sqrt(float(d_k))
    p = jax.nn.softmax(scores, axis=-1)
    y = jnp.einsum("bqk,bkd->bqd", p, v)
    return lin(y, params["o_w"], params["o_b"])


if __name__ == "__main__":
    B, S, D = 2, 8, 32   # batch, seq, embed_dim

    key = jax.random.PRNGKey(0)
    ks = jax.random.split(key, 9)
    scale = 1.0 / math.sqrt(D)
    params = {
        "q_w": jax.random.uniform(ks[0], (D, D), jnp.float32, -scale, scale),
        "q_b": jax.random.uniform(ks[1], (D,), jnp.float32, -scale, scale),
        "k_w": jax.random.uniform(ks[2], (D, D), jnp.float32, -scale, scale),
        "k_b": jax.random.uniform(ks[3], (D,), jnp.float32, -scale, scale),
        "v_w": jax.random.uniform(ks[4], (D, D), jnp.float32, -scale, scale),
        "v_b": jax.random.uniform(ks[5], (D,), jnp.float32, -scale, scale),
        "o_w": jax.random.uniform(ks[6], (D, D), jnp.float32, -scale, scale),
        "o_b": jax.random.uniform(ks[7], (D,), jnp.float32, -scale, scale),
    }
    x = jax.random.normal(ks[8], (B, S, D), jnp.float32)

    ref = _reference(x, params)

    # f32 matmul operands (only deviation from exact f32 is the EUP approx recip).
    attn_f32 = make_self_attention(params, compute_dtype=jnp.float32)
    out_f32 = jax.block_until_ready(attn_f32(x))
    assert out_f32.shape == (B, S, D)
    assert jnp.allclose(out_f32, ref, atol=2e-3, rtol=2e-3)

    # bf16 matmul operands (valid on v5e/v6e/v7x MXUs); softmax math stays f32.
    attn_bf16 = make_self_attention(params, compute_dtype=jnp.bfloat16)
    out_bf16 = jax.block_until_ready(attn_bf16(x))
    assert out_bf16.shape == (B, S, D)
    assert jnp.allclose(out_bf16, ref, atol=5e-2, rtol=5e-2)

    print("KERNEL_OK")
</pallas_src>

<mosaic_0001>
module attributes {stable_mosaic.version = 11 : i64} {
  func.func @_self_attention_kernel(%arg0: i32, %arg1: memref<1x8x32xf32, #tpu.memory_space<vmem>>, %arg2: memref<32x384xf32, #tpu.memory_space<vmem>>, %arg3: memref<1x384xf32, #tpu.memory_space<vmem>>, %arg4: memref<128x128xf32, #tpu.memory_space<vmem>>, %arg5: memref<1x128xf32, #tpu.memory_space<vmem>>, %arg6: memref<1x8x128xf32, #tpu.memory_space<vmem>>) attributes {dimension_semantics = [#tpu.dimension_semantics<parallel>], iteration_bounds = array<i64: 2>, scalar_prefetch = 0 : i64, scratch_operands = 0 : i64, tpu.core_type = #tpu.core_type<tc>, window_params = [{transform_indices = @transform_0, window_bounds = array<i64: 1, 8, 32>}, {pipeline_mode = #tpu.pipeline_mode<synchronous>, transform_indices = @transform_1, window_bounds = array<i64: 32, 384>}, {pipeline_mode = #tpu.pipeline_mode<synchronous>, transform_indices = @transform_2, window_bounds = array<i64: 1, 384>}, {pipeline_mode = #tpu.pipeline_mode<synchronous>, transform_indices = @transform_3, window_bounds = array<i64: 128, 128>}, {pipeline_mode = #tpu.pipeline_mode<synchronous>, transform_indices = @transform_4, window_bounds = array<i64: 1, 128>}, {transform_indices = @transform_5, window_bounds = array<i64: 1, 8, 128>}]} {
    %c0 = arith.constant 0 : index
    %c0_0 = arith.constant 0 : index
    %c0_1 = arith.constant 0 : index
    %0 = vector.load %arg1[%c0, %c0_0, %c0_1] : memref<1x8x32xf32, #tpu.memory_space<vmem>>, vector<1x8x32xf32>
    %1 = vector.shape_cast %0 : vector<1x8x32xf32> to vector<8x32xf32>
    %c0_2 = arith.constant 0 : index
    %c0_3 = arith.constant 0 : index
    %2 = vector.load %arg2[%c0_2, %c0_3] : memref<32x384xf32, #tpu.memory_space<vmem>>, vector<32x384xf32>
    %cst = arith.constant dense<0.000000e+00> : vector<8x384xf32>
    %3 = tpu.matmul %1, %2, %cst {dimension_numbers = #tpu.dot_dimension_numbers<[1], [0], [0], [1], [0, 0, 1, 1], [], []>} : vector<8x32xf32>, vector<32x384xf32>, vector<8x384xf32> -> vector<8x384xf32>
    %c0_4 = arith.constant 0 : index
    %c0_5 = arith.constant 0 : index
    %4 = vector.load %arg3[%c0_4, %c0_5] : memref<1x384xf32, #tpu.memory_space<vmem>>, vector<1x384xf32>
    %5 = vector.broadcast %4 : vector<1x384xf32> to vector<8x384xf32>
    %6 = arith.addf %3, %5 : vector<8x384xf32>
    %7 = vector.shape_cast %6 : vector<8x384xf32> to vector<1x8x384xf32>
    %8 = vector.extract_strided_slice %7 {offsets = [0, 0, 0], sizes = [1, 8, 128], strides = [1, 1, 1]} : vector<1x8x384xf32> to vector<1x8x128xf32>
    %9 = vector.extract_strided_slice %7 {offsets = [0, 0, 128], sizes = [1, 8, 128], strides = [1, 1, 1]} : vector<1x8x384xf32> to vector<1x8x128xf32>
    %10 = vector.extract_strided_slice %7 {offsets = [0, 0, 256], sizes = [1, 8, 128], strides = [1, 1, 1]} : vector<1x8x384xf32> to vector<1x8x128xf32>
    %cst_6 = arith.constant dense<0.000000e+00> : vector<1x8x8xf32>
    %11 = tpu.matmul %8, %9, %cst_6 {dimension_numbers = #tpu.dot_dimension_numbers<[2], [2], [1], [1], [0, 0, 0, 1, 1, 1], [0], [0]>} : vector<1x8x128xf32>, vector<1x8x128xf32>, vector<1x8x8xf32> -> vector<1x8x8xf32>
    %cst_7 = arith.constant dense<0xFF800000> : vector<1x8xf32>
    %12 = vector.multi_reduction <maximumf>, %11, %cst_7 [2] : vector<1x8x8xf32> to vector<1x8xf32>
    %13 = vector.shape_cast %12 : vector<1x8xf32> to vector<1x8x1xf32>
    %14 = vector.broadcast %13 : vector<1x8x1xf32> to vector<1x8x8xf32>
    %15 = arith.subf %11, %14 : vector<1x8x8xf32>
    %16 = math.exp %15 : vector<1x8x8xf32>
    %cst_8 = arith.constant dense<0.000000e+00> : vector<1x8xf32>
    %17 = vector.multi_reduction <add>, %16, %cst_8 [2] : vector<1x8x8xf32> to vector<1x8xf32>
    %18 = vector.shape_cast %17 : vector<1x8xf32> to vector<1x8x1xf32>
    %19 = tpu.reciprocal %18 {approx = true} : vector<1x8x1xf32> -> vector<1x8x1xf32>
    %20 = vector.broadcast %19 : vector<1x8x1xf32> to vector<1x8x8xf32>
    %21 = arith.mulf %16, %20 : vector<1x8x8xf32>
    %cst_9 = arith.constant dense<0.000000e+00> : vector<1x8x128xf32>
    %22 = tpu.matmul %21, %10, %cst_9 {dimension_numbers = #tpu.dot_dimension_numbers<[2], [1], [1], [2], [0, 0, 0, 1, 1, 2], [0], [0]>} : vector<1x8x8xf32>, vector<1x8x128xf32>, vector<1x8x128xf32> -> vector<1x8x128xf32>
    %23 = vector.shape_cast %22 : vector<1x8x128xf32> to vector<8x128xf32>
    %c0_10 = arith.constant 0 : index
    %c0_11 = arith.constant 0 : index
    %24 = vector.load %arg4[%c0_10, %c0_11] : memref<128x128xf32, #tpu.memory_space<vmem>>, vector<128x128xf32>
    %cst_12 = arith.constant dense<0.000000e+00> : vector<8x128xf32>
    %25 = tpu.matmul %23, %24, %cst_12 {dimension_numbers = #tpu.dot_dimension_numbers<[1], [0], [0], [1], [0, 0, 1, 1], [], []>} : vector<8x128xf32>, vector<128x128xf32>, vector<8x128xf32> -> vector<8x128xf32>
    %c0_13 = arith.constant 0 : index
    %c0_14 = arith.constant 0 : index
    %26 = vector.load %arg5[%c0_13, %c0_14] : memref<1x128xf32, #tpu.memory_space<vmem>>, vector<1x128xf32>
    %27 = vector.broadcast %26 : vector<1x128xf32> to vector<8x128xf32>
    %28 = arith.addf %25, %27 : vector<8x128xf32>
    %29 = vector.shape_cast %28 : vector<8x128xf32> to vector<1x8x128xf32>
    %c0_15 = arith.constant 0 : index
    %c0_16 = arith.constant 0 : index
    %c0_17 = arith.constant 0 : index
    %30 = vector.load %arg6[%c0_15, %c0_16, %c0_17] : memref<1x8x128xf32, #tpu.memory_space<vmem>>, vector<1x8x128xf32>
    tpu.vector_store %arg6[%c0_15, %c0_16, %c0_17], %29 {strides = array<i32>} : memref<1x8x128xf32, #tpu.memory_space<vmem>>, vector<1x8x128xf32>,
    return
  }
  func.func @transform_0(%arg0: i32) -> (i32, i32, i32) {
    %c0_i32 = arith.constant 0 : i32
    %c0_i32_0 = arith.constant 0 : i32
    %c0_i32_1 = arith.constant 0 : i32
    return %arg0, %c0_i32, %c0_i32_0 : i32, i32, i32
  }
  func.func @transform_1(%arg0: i32) -> (i32, i32) {
    %c0_i32 = arith.constant 0 : i32
    %c0_i32_0 = arith.constant 0 : i32
    %c0_i32_1 = arith.constant 0 : i32
    return %c0_i32, %c0_i32_0 : i32, i32
  }
  func.func @transform_2(%arg0: i32) -> (i32, i32) {
    %c0_i32 = arith.constant 0 : i32
    %c0_i32_0 = arith.constant 0 : i32
    %c0_i32_1 = arith.constant 0 : i32
    return %c0_i32, %c0_i32_0 : i32, i32
  }
  func.func @transform_3(%arg0: i32) -> (i32, i32) {
    %c0_i32 = arith.constant 0 : i32
    %c0_i32_0 = arith.constant 0 : i32
    %c0_i32_1 = arith.constant 0 : i32
    return %c0_i32, %c0_i32_0 : i32, i32
  }
  func.func @transform_4(%arg0: i32) -> (i32, i32) {
    %c0_i32 = arith.constant 0 : i32
    %c0_i32_0 = arith.constant 0 : i32
    %c0_i32_1 = arith.constant 0 : i32
    return %c0_i32, %c0_i32_0 : i32, i32
  }
  func.func @transform_5(%arg0: i32) -> (i32, i32, i32) {
    %c0_i32 = arith.constant 0 : i32
    %c0_i32_0 = arith.constant 0 : i32
    %c0_i32_1 = arith.constant 0 : i32
    return %arg0, %c0_i32, %c0_i32_0 : i32, i32, i32
  }
}

</mosaic_0001>

<bundles_post_ra>
// kernel: apply.1
= control target key start
LH: loop header
LB: loop body
LE: loop exit
PB: predicated region body
PF: predicated region fallthrough
CT: control target
= control target key end

     0   :  { %10 = vsyncpa [#allocation3], 0  ;;  %s1469_s0 = inlined_call_operand.hbm [shape: f32[2,8,32], index: 0, kind: input, shape index: {}]   ;;  %s1470_s1 = inlined_call_operand.hbm [shape: f32[32,384], index: 1, kind: input, shape index: {}]   ;;  %s1471_s2 = inlined_call_operand.vmem [shape: f32[1,384], index: 2, kind: input, shape index: {}]   ;;  %s1472_s3 = inlined_call_operand.hbm [shape: f32[128,128], index: 3, kind: input, shape index: {}]   ;;  %s1473_s4 = inlined_call_operand.vmem [shape: f32[1,128], index: 4, kind: input, shape index: {}]   ;;  %s1474_s5 = inlined_call_operand.hbm [shape: f32[2,8,128], index: 5, kind: output, shape index: {}]  }
   0x1   :  { %12 = vsyncpa [#allocation3 + $0x1], 0 }
   0x2   :  { %13 = vsyncpa [#allocation6], 0 }
   0x3   :  { %14 = vsyncpa [#allocation4], 0 }
   0x4   :  { %16 = vsyncpa [#allocation4 + $0x1], 0  ;;  %s1213_s18 = smov 0   ;;  %s1215_s19 = smov 0  }
   0x5   :  { %s1217_s20 = smov 0   ;;  %s1219_s21 = smov 0  }
   0x6 LB: > { %s1234_s22 = sadd.s32 4294967295, %s1170_s21   ;;  %s796_s23 = sadd.s32 4294967294, %s1170_s21   ;;  %s1170_s21 = sphi %s1219_s21, %s1494_s21   ;;  %s1166_s20 = sphi %s1217_s20, %s1493_s20   ;;  %s1162_s19 = sphi %s1215_s19, %s1492_s19   ;;  %s1158_s18 = sphi %s1213_s18, %s1491_s18  }
   0x7   : > { %p42_p0 = scmp.ne.s32.totalorder %s1162_s19, %s1158_s18  ;;  %p1475_p1 = scmp.eq.s32.totalorder %s1234_s22, 0 }
   0x8   : > { %p156_p3 = scmp.eq.s32.totalorder %s796_s23, 1  ;;  %p797_p5 = scmp.ge.s32.totalorder %s1170_s21, 1 }
   0x9   : > { %p1243_p4 = por %p1475_p1, %p42_p0  ;;  %p163_p7 = scmp.lt.s32.totalorder %s1170_s21, 3 }
   0xa   : > { %p1248_p6 = por %p156_p3, %p42_p0  ;;  %s1172_s27 = smov [#allocation5]  }
   0xb   : > { %s1478_s24 = scalar_select %p1243_p4, 1, 0 }
   0xc   : > { %s1479_s25 = scalar_select %p1248_p6, 1, 0 }
   0xd   : > { %p1253_p8 = pnand %p797_p5, %p163_p7  ;;  %s175_s28 = sshll.u32 %s1172_s27, 4  ;;  %s1257_s28 = int_to_ptr.vmem [resolvable:$true] %s175_s28 }
   0xe   : > { %s1173_s30 = smov [#allocation7]   ;;  %s1014_s9 = scalar_lea.hbm %s1470_s1, 1536 }
   0xf   : > { %p948_p9 = pneg %p1253_p8  ;;  %s191_s6 = sshll.u32 %s1173_s30, 4  ;;  %s1268_s6 = int_to_ptr.vmem [resolvable:$true] %s191_s6 }
  0x10   : > { %p1015_p12 = scmp.ne.s32.totalorder %s1470_s1, %s1014_s9  ;;  %p1021_p5 = scmp.lt.u32.totalorder %s1014_s9, %s1470_s1 }
  0x11   : > { %p1264_p11 = pnand %p948_p9, %p1475_p1 }
  0x13   : > { %p1016_p13 = pneg %p1264_p11 }
  0x15   : > { %p1017_p0 = pnand %p1016_p13, %p1015_p12 }
  0x17   : > { %p1018_p3 = pneg %p1017_p0 }
  0x19   : > { %p1023_p7 = pnand %p1021_p5, %p1018_p3 }
  0x1b   : > { %1026 = shalt.err (!%p1023_p7)
}
  0x1c   : > { %s1027_s14 = scalar_lea.vmem %s1257_s28, 1536  ;;  %p1035_p2 = scmp.lt.s32.totalorder %s1257_s28, %s1257_s28 }
  0x1d   : > { %p1028_p9 = scmp.ne.s32.totalorder %s1257_s28, %s1027_s14  ;;  %p1036_p12 = scmp.lt.s32.totalorder %s1027_s14, %s1027_s14 }
  0x1f   : > { %p1030_p10 = pnand %p1028_p9, %p1016_p13  ;;  %p1037_p0 = por %p1036_p12, %p1035_p2 }
  0x21   : > { %p1031_p1 = pneg %p1030_p10 }
  0x23   : > { %p1038_p6 = pnand %p1037_p0, %p1031_p1 }
  0x25   : > { %1041 = shalt.err (!%p1038_p6)
}
  0x26   : > { %s1174_s15 = smov 384   ;;  %s1175_s16 = smov 24  }
  0x27   : > { %951 = dma.hbm_to_vmem [thread:$0]  (!%p1264_p11), %s1470_s1, 1536, %s1257_s28, [#allocation6], %s1174_s15, %s1174_s15, %s1175_s16  }
  0x28   : > { %s1042_s7 = scalar_lea.hbm %s1472_s3, 2048 }
  0x29   : > { %p1043_p2 = scmp.ne.s32.totalorder %s1472_s3, %s1042_s7  ;;  %p1049_p10 = scmp.lt.u32.totalorder %s1042_s7, %s1472_s3 }
  0x2b   : > { %p1045_p1 = pnand %p1043_p2, %p1016_p13 }
  0x2d   : > { %p1046_p6 = pneg %p1045_p1 }
  0x2f   : > { %p1051_p3 = pnand %p1049_p10, %p1046_p6 }
  0x31   : > { %1054 = shalt.err (!%p1051_p3)
}
  0x32   : > { %s1055_s28 = scalar_lea.vmem %s1268_s6, 2048  ;;  %p1063_p12 = scmp.lt.s32.totalorder %s1268_s6, %s1268_s6 }
  0x33   : > { %p1056_p5 = scmp.ne.s32.totalorder %s1268_s6, %s1055_s28  ;;  %p1064_p0 = scmp.lt.s32.totalorder %s1055_s28, %s1055_s28 }
  0x35   : > { %p1058_p7 = pnand %p1056_p5, %p1016_p13  ;;  %p1065_p2 = por %p1064_p0, %p1063_p12 }
  0x37   : > { %p1059_p9 = pneg %p1058_p7 }
  0x39   : > { %p1066_p1 = pnand %p1065_p2, %p1059_p9 }
  0x3b   : > { %1069 = shalt.err (!%p1066_p1)
}
  0x3c   : > { %s1176_s12 = smov 128   ;;  %s1177_s13 = smov 8  }
  0x3d   : > { %954 = dma.hbm_to_vmem [thread:$0]  (!%p1264_p11), %s1472_s3, 2048, %s1268_s6, [#allocation6], %s1176_s12, %s1176_s12, %s1177_s13  }
  0x3e   : > { %s1323_s16 = sadd.s32 1, %s1170_s21   ;;  %s29_s23 = sadd.s32 1, %s1166_s20 }
  0x3f   : > { %s26_s17 = ssub.s32 %s1170_s21, %s1323_s16  ;;  %p36_p6 = scmp.ne.s32.totalorder %s1166_s20, %s1162_s19 }
  0x40   : > { %p27_p13 = scmp.eq.s32.totalorder %s26_s17, 0  ;;  %p37_p10 = scmp.eq.s32.totalorder %s1170_s21, 0 }
  0x41   : > { %p1482_p5 = scmp.eq.s32.totalorder %s1234_s22, 1  ;;  %p965_p9 = scmp.lt.s32.totalorder %s1170_s21, 2 }
  0x42   : > { %s1332_s27 = scalar_select %p27_p13, %s1166_s20, %s29_s23  }
  0x43   : > { %p38_p3 = por %p37_p10, %p36_p6  ;;  %p1336_p7 = por %p1482_p5, %p36_p6 }
  0x44   : > { %s208_s29 = sand.u32 1, %s1166_s20   ;;  %s802_s6 = sshll.u32 %s1170_s21, 7 }
  0x45   : > { %s1483_s30 = scalar_select %p1336_p7, 1, 0 }
  0x46   : > { %s801_s7 = sshll.u32 %s208_s29, 3  ;;  %s1346_s10 = scalar_lea.hbm %s1469_s0, %s802_s6 }
  0x47   : > { %s212_s11 = scalar_lea.vmem [#allocation2], %s801_s7  ;;  %p1350_p11 = pnand %p965_p9, %p38_p3 }
  0x48   : > { %s219_s28 = sshll.u32 %s212_s11, 4  ;;  %s209_s13 = scalar_lea.sflag [#allocation3], %s208_s29  ;;  %s1348_s28 = int_to_ptr.vmem [resolvable:$true] %s219_s28 }
  0x49   : > { %s1070_s14 = scalar_lea.hbm %s1346_s10, 128  ;;  %p1072_p0 = pneg %p1350_p11 }
  0x4a   : > { %p1071_p12 = scmp.ne.s32.totalorder %s1346_s10, %s1070_s14  ;;  %s1075_s23 = scalar_lea.hbm %s1469_s0, 256 }
  0x4b   : > { %p1076_p13 = scmp.lt.u32.totalorder %s1346_s10, %s1469_s0  ;;  %p1077_p6 = scmp.lt.u32.totalorder %s1075_s23, %s1070_s14 }
  0x4c   : > { %p1073_p2 = pnand %p1072_p0, %p1071_p12  ;;  %p1079_p3 = scmp.lt.u32.totalorder %s1070_s14, %s1346_s10 }
  0x4d   : > { %p1078_p10 = por %p1077_p6, %p1076_p13 }
  0x4e   : > { %p1074_p1 = pneg %p1073_p2 }
  0x4f   : > { %p1080_p5 = por %p1079_p3, %p1078_p10 }
  0x51   : > { %p1081_p9 = pnand %p1080_p5, %p1074_p1 }
  0x53   : > { %1084 = shalt.err (!%p1081_p9)
}
  0x54   : > { %s1085_s29 = scalar_lea.vmem %s1348_s28, 128  ;;  %s1178_s8 = smov [#allocation2]  }
  0x55   : > { %p1086_p12 = scmp.ne.s32.totalorder %s1348_s28, %s1085_s29  ;;  %s1090_s9 = sshll.u32 %s1178_s8, 4  ;;  %s1091_s9 = int_to_ptr.vmem [resolvable:$false] %s1090_s9 }
  0x56   : > { %s1092_s11 = scalar_lea.vmem %s1091_s9, 256  ;;  %p1093_p4 = scmp.lt.s32.totalorder %s1348_s28, %s1091_s9 }
  0x57   : > { %p1088_p2 = pnand %p1086_p12, %p1072_p0  ;;  %p1094_p13 = scmp.lt.s32.totalorder %s1092_s11, %s1085_s29 }
  0x59   : > { %p1089_p7 = pneg %p1088_p2  ;;  %p1095_p6 = por %p1094_p13, %p1093_p4 }
  0x5b   : > { %p1096_p10 = pnand %p1095_p6, %p1089_p7 }
  0x5d   : > { %1099 = shalt.err (!%p1096_p10)
}
  0x5e   : > { %958 = dma.hbm_to_vmem [thread:$0]  (!%p1350_p11), %s1346_s10, 128, %s1348_s28, %s209_s13  }
  0x5f   : > { %228 = sbr.rel (%p1253_p8) target bundleno = 1301 (0x515), region = 40  ;;  %s1382_s14 = sand.u32 (!%p1253_p8), 1, %s1162_s19  }
  0x60   : > { %s804_s15 = sshll.u32 (!%p1253_p8), %s1382_s14, 3  ;;  %s231_s17 = scalar_lea.sflag (!%p1253_p8), [#allocation3], %s1382_s14 }
  0x61   : > { %s234_s23 = scalar_lea.vmem (!%p1253_p8), [#allocation2], %s804_s15  ;;  %p1485_p4 = scmp.ne.s32.totalorder (!%p1253_p8), %s1478_s24, 0 }
  0x66   : > { %1145 = dma.done.wait (%p1485_p4), %s231_s17, 128  }
  0x67   : > { %1147 = vsyncadd (%p1485_p4), %s231_s17, 4294967168  ;;  %p1486_p7 = scmp.eq.s32.totalorder %s1234_s22, 0 }
  0x69   : > { %1149 = dma.done.wait (%p1486_p7), [#allocation6], 3584   ;;  %p1487_p8 = pmov %p1486_p7 }
  0x6a   : > { %v1179_v0 = vmov 0.0   ;;  %v1180_v1 = vmov 0.0|0.0   ;;  %v271_v2 = vld [vmem:[#allocation5 + $0x8] sm:$0xff]  ;;  %v274_v3 = vld [vmem:[#allocation5 + $0x20] sm:$0xff]  ;;  %v273_v6 = vld [vmem:[#allocation5 + $0x18] sm:$0xff]  ;;  %vm299_vm0 = vcmask 261120   ;;  %v284_v21 = vlaneseq }
  0x6b   : > { %1151 = vsyncadd (%p1487_p8), [#allocation6], 4294963712  ;;  %367 = vmatprep.mubr.f32.mxu1 %v1179_v0  ;;  %912 = vmatprep.subr.bf16.mxu0 %v1180_v1  ;;  %v270_v4 = vld [vmem:[#allocation5] sm:$0xff]  ;;  %v898_v5 = vpack.c.bf16 %v274_v3, %v271_v2  ;;  %v277_v7 = vld [vmem:[#allocation5 + $0x38] sm:$0xff]  ;;  %vm1181_vm1 = vmmov 0   ;;  %vm514_vm2 = vcmask 64512  }
  0x6c   : > { %v280_v8 = vld [vmem:[#allocation5 + $0x50] sm:$0xff]  ;;  %v900_v9 = vpack.c.bf16 %v273_v6, %v270_v4  ;;  %v279_v12 = vld [vmem:[#allocation5 + $0x48] sm:$0xff]  ;;  %v278_v18 = vld [vmem:[#allocation5 + $0x40] sm:$0xff]  ;;  %895 = vmatprep.mubr.msk.f32.mxu0 %vm1181_vm1, %v1179_v0  ;;  %v285_v22 = vshrl.u32 %v284_v21, 7  ;;  %s813_s12 = sshll.u32 %s1234_s22, 7  ;;  %s268_s13 = scalar_lea.vmem [#allocation8], %s804_s15 }
  0x6d   : > { %v902_v10 = vpack.c.bf16 %v280_v8, %v277_v7  ;;  %v276_v11 = vld [vmem:[#allocation5 + $0x30] sm:$0xff]  ;;  %899 = vmatprep.subr.bf16.mxu1 %v898_v5  ;;  %v275_v15 = vld [vmem:[#allocation5 + $0x28] sm:$0xff]  ;;  %v281_v19 = vld [vmem:[#allocation5 + $0x58] sm:$0xff]  ;;  %s707_s7 = sshll.u32 %s268_s13, 4  ;;  %s1425_s8 = scalar_lea.hbm %s1474_s5, %s813_s12  ;;  %s1427_s7 = int_to_ptr.vmem [resolvable:$true] %s707_s7 }
  0x6e   : > { %901 = vmatpush1.bf16.msra.mxu1 %v900_v9  ;;  %v904_v13 = vpack.c.bf16 %v279_v12, %v276_v11  ;;  %v272_v14 = vld [vmem:[#allocation5 + $0x10] sm:$0xff]  ;;  %v910_v20 = vpack.c.bf16 %v281_v19, %v278_v18  ;;  %v290_v23 = vsub.s32 1, %v285_v22  ;;  %v286_v25 = vsub.s32 0, %v285_v22  ;;  %v599_v45 = vld [vmem:[#allocation7] sm:$0xff]  ;;  %v600_v46 = vld [vmem:[#allocation7 + $0x8] sm:$0xff]  ;;  %s694_s9 = scalar_lea.sflag [#allocation4], %s1382_s14 }
  0x6f   : > { %903 = vmatprep.subr.bf16.mxu1 %v902_v10  ;;  %v269_v16 = vld [vmem:[%s234_s23] sm:$0xff]  ;;  %v907_v17 = vpack.c.bf16 %v275_v15, %v272_v14  ;;  %v294_v32 = vsub.s32 2, %v285_v22  ;;  %v913_v48 = vpack.c.bf16 %v600_v46, %v599_v45  ;;  %v603_v51 = vld [vmem:[#allocation7 + $0x20] sm:$0xff]  ;;  %v604_v52 = vld [vmem:[#allocation7 + $0x28] sm:$0xff]  ;;  %s1100_s11 = scalar_lea.vmem %s1427_s7, 128  ;;  %p1488_p0 = scmp.ne.s32.totalorder %s1483_s30, 0 }
  0x70   : > { %v282_v24 = vld [vmem:[%s1471_s2] sm:$0x7]  ;;  %v602_v49 = vld [vmem:[#allocation7 + $0x18] sm:$0xff]  ;;  %v919_v53 = vpack.c.bf16 %v604_v52, %v603_v51  ;;  %v607_v57 = vld [vmem:[#allocation7 + $0x40] sm:$0xff]  ;;  %p1101_p11 = scmp.ne.s32.totalorder %s1427_s7, %s1100_s11  ;;  %s1182_s22 = smov [#allocation8]  }
  0x71   : > { %v291_v26 = vrot.slane %v282_v24, %v290_v23  ;;  %v287_v28 = vrot.slane %v282_v24, %v286_v25  ;;  %v295_v33 = vrot.slane %v282_v24, %v294_v32  ;;  %v601_v47 = vld [vmem:[#allocation7 + $0x10] sm:$0xff]  ;;  %914 = vmatpush3.bf16.msra.mxu0 %v913_v48  ;;  %v606_v55 = vld [vmem:[#allocation7 + $0x38] sm:$0xff]  ;;  %v608_v58 = vld [vmem:[#allocation7 + $0x48] sm:$0xff]  ;;  %s1104_s15 = sshll.u32 %s1182_s22, 4  ;;  %s1105_s15 = int_to_ptr.vmem [resolvable:$false] %s1104_s15 }
  0x72   : > { %905 = vmatpush1.bf16.msra.mxu1 %v904_v13  ;;  %v916_v50 = vpack.c.bf16 %v602_v49, %v601_v47  ;;  %915 = vmatprep.subr.bf16.mxu0 %v1180_v1  ;;  %v605_v54 = vld [vmem:[#allocation7 + $0x30] sm:$0xff]  ;;  %v925_v59 = vpack.c.bf16 %v608_v58, %v607_v57  ;;  %v610_v61 = vld [vmem:[#allocation7 + $0x58] sm:$0xff]  ;;  %v611_v63 = vld [vmem:[#allocation7 + $0x60] sm:$0xff]  ;;  %p1102_p1 = pnand %p1101_p11, %p1488_p0  ;;  %s1106_s17 = scalar_lea.vmem %s1105_s15, 256 }
  0x73   : > { %906 = vmatprep.subr.bf16.mxu1 %v1180_v1  ;;  %v922_v56 = vpack.c.bf16 %v606_v55, %v605_v54  ;;  %v609_v60 = vld [vmem:[#allocation7 + $0x50] sm:$0xff]  ;;  %v614_v4 = vld [vmem:[#allocation7 + $0x78] sm:$0xff]  ;;  %p1107_p5 = scmp.lt.s32.totalorder %s1427_s7, %s1105_s15  ;;  %p1108_p9 = scmp.lt.s32.totalorder %s1106_s17, %s1100_s11 }
  0x74   : > { %v928_v62 = vpack.c.bf16 %v610_v61, %v609_v60  ;;  %v613_v3 = vld [vmem:[#allocation7 + $0x70] sm:$0xff]  ;;  %p1103_p3 = pneg %p1102_p1 }
  0x75   : > { %808 = vmatmul.mubr.msk.f32.vlgmr.msra.gmra.mrb[0].mxu1 %vm299_vm0, %v269_v16  ;;  %917 = vmatpush3.bf16.msra.mxu0 %v916_v50  ;;  %v934_v5 = vpack.c.bf16 %v614_v4, %v613_v3  ;;  %v811_v11 = vld [vmem:[%s1473_s4] ss:$0 sm:$0xff]  ;;  %p1109_p12 = por %p1108_p9, %p1107_p5 }
  0x76   : > { %908 = vmatpush3.bf16.msra.mxu1 %v907_v17  ;;  %850 = vmatprep.mubr.msk.f32.mxu1 %vm1181_vm1, %v1179_v0 }
  0x77   : > { %909 = vmatprep.subr.bf16.mxu1 %v1180_v1  ;;  %918 = vmatprep.subr.bf16.mxu0 %v1180_v1  ;;  %p1110_p2 = pnand %p1109_p12, %p1103_p3 }
  0x79   : > { %920 = vmatpush3.bf16.msra.mxu0 %v919_v53 }
  0x7a   : > { %911 = vmatpush3.bf16.msra.mxu1 %v910_v20  ;;  %921 = vmatprep.subr.bf16.mxu0 %v1180_v1 }
  0x7b   : > { %853 = vmatprep.subr.mxu1 %v1179_v0 }
  0x7d   : > { %851 = vmatmul.mubr.msk.f32.vlgmr.msra.gmra.mrb[2].mxu1 %vm299_vm0, %v269_v16  ;;  %923 = vmatpush3.bf16.msra.mxu0 %v922_v56 }
  0x7e   : > { %855 = vmatprep.mubr.msk.f32.mxu1 %vm1181_vm1, %v1179_v0  ;;  %924 = vmatprep.subr.bf16.mxu0 %v1180_v1 }
  0x81   : > { %926 = vmatpush3.bf16.msra.mxu0 %v925_v59 }
  0x82   : > { %927 = vmatprep.subr.bf16.mxu0 %v1180_v1 }
  0x85   : > { %929 = vmatpush3.bf16.msra.mxu0 %v928_v62 }
  0x86   : > { %930 = vmatprep.subr.bf16.mxu0 %v1180_v1 }
 0x148   : > { %v369_v27 = vpop.f32.mrb[0].mxu1 }
 0x149   : > { %v371_v29 = vpop.f32.mrb[1].mxu1  ;;  %v370_v31 = vadd.f32 %v369_v27, %v287_v28 }
 0x14a   : > { %v372_v30 = vadd.f32 %v371_v29, %v291_v26 }
 0x14c   : > { %854 = vmatpush3.xpose.msra.mxu1 %v372_v30 }
 0x14d   : > { %858 = vmatprep.subr.mxu1 %v1179_v0 }
 0x14f   : > { %856 = vmatmul.mubr.f32.vlgmr.msra.gmra.mrb[4].mxu1 %v370_v31 }
 0x150   : > { %860 = vmatprep.mubr.msk.f32.mxu1 %vm1181_vm1, %v1179_v0  ;;  %v440_v34 = vpop.f32.mrb[2].mxu1  ;;  %v612_v0 = vld [vmem:[#allocation7 + $0x68] sm:$0xff] }
 0x151   : > { %v441_v35 = vadd.f32 %v440_v34, %v295_v33  ;;  %v852_v36 = vpop.f32.mrb[3].mxu1  ;;  %v931_v2 = vpack.c.bf16 %v612_v0, %v611_v63 }
 0x153   : > { %859 = vmatpush3.msra.mxu1 %v441_v35  ;;  %932 = vmatpush3.bf16.msra.mxu0 %v931_v2 }
 0x154   : > { %933 = vmatprep.subr.bf16.mxu0 %v1180_v1 }
 0x157   : > { %935 = vmatpush3.bf16.msra.mxu0 %v934_v5 }
 0x222   : > { %v510_v37 = vpop.f32.mrb[4].mxu1 }
 0x223   : > { %v857_v38 = vpop.f32.mrb[5].mxu1  ;;  %v515_v39 = vsel %vm514_vm2, %v510_v37, -inf }
 0x224   : > { %516 = vmax.xlane.f32.xlu0 %v515_v39 }
 0x2b1   : > { %v517_v40 = vpop.xlane.xlu0 %516 }
 0x2b2   : > { %v518_v41 = vsub.f32 %v510_v37, %v517_v40 }
 0x2b4   : > { %v519_v42 = vmul.f32 1.442695, %v518_v41 }
 0x2b6   : > { %1010 = vpow2.f32 %v519_v42 }
 0x2c0   : > { %v1011_v43 = vpop.eup %1010 }
 0x2c1   : > { %v521_v44 = vsel %vm514_vm2, %v1011_v43, 0.0 }
 0x2c2   : > { %522 = vadd.xlane.f32.xlu0 %v521_v44 }
 0x34f   : > { %v523_v6 = vpop.xlane.xlu0 %522 }
 0x350   : > { %1012 = vrcp.f32 %v523_v6 }
 0x35a   : > { %v1013_v7 = vpop.eup %1012 }
 0x35b   : > { %v525_v8 = vmul.f32 %v1013_v7, %v1011_v43 }
 0x35d   : > { %861 = vmatmul.mubr.msk.f32.vlgmr.msra.gmra.mrb[6].mxu1 %vm514_vm2, %v525_v8 }
 0x430   : > { %v595_v9 = vpop.f32.mrb[6].mxu1 }
 0x431   : > { %v862_v10 = vpop.f32.mrb[7].mxu1  ;;  %896 = vmatmul.mubr.f32.vlgmr.msra.gmra.mrb[0].mxu0 %v595_v9 }
 0x504   : > { %v688_v1 = vpop.f32.mrb[0].mxu0 }
 0x505   : > { %v689_v12 = vadd.f32 %v811_v11, %v688_v1  ;;  %v897_v13 = vpop.f32.mrb[1].mxu0 }
 0x507   : > { %692 = vst [vmem:[%s268_s13] sm:$0xff] %v689_v12 }
 0x508   : > { %1113 = shalt.err (!%p1110_p2)
}
 0x509   : > { %s1114_s14 = scalar_lea.hbm %s1425_s8, 128  ;;  %s1118_s26 = scalar_lea.hbm %s1474_s5, 256 }
 0x50a   : > { %p1115_p13 = scmp.ne.s32.totalorder %s1425_s8, %s1114_s14  ;;  %p1119_p4 = scmp.lt.u32.totalorder %s1425_s8, %s1474_s5 }
 0x50b   : > { %p1120_p7 = scmp.lt.u32.totalorder %s1118_s26, %s1114_s14  ;;  %p1122_p11 = scmp.lt.u32.totalorder %s1114_s14, %s1425_s8 }
 0x50c   : > { %p1116_p6 = pnand %p1115_p13, %p1488_p0 }
 0x50d   : > { %p1121_p8 = por %p1120_p7, %p1119_p4 }
 0x50e   : > { %p1117_p10 = pneg %p1116_p6 }
 0x50f   : > { %p1123_p1 = por %p1122_p11, %p1121_p8 }
 0x511   : > { %p1124_p3 = pnand %p1123_p1, %p1117_p10 }
 0x513   : > { %1127 = shalt.err (!%p1124_p3)
}
 0x514   : > { %946 = dma.vmem_to_hbm [thread:$0]  (%p1488_p0), %s1427_s7, 128, %s1425_s8, %s694_s9  }
 0x515 PF: > { %s719_s12 = sand.u32 1, %s1158_s18   ;;  %p1489_p5 = scmp.ne.s32.totalorder %s1479_s25, 0 }
 0x516   : > { %p1490_p9 = scmp.ge.s32.totalorder %s1170_s21, 2  ;;  %s720_s13 = scalar_lea.sflag [#allocation4], %s719_s12 }
 0x518   : > { %p960_p12 = pnand %p1490_p9, %p1489_p5 }
 0x51a   : > { %1153 = dma.done.wait (!%p960_p12), %s720_s13, 128  }
 0x51b   : > { %1155 = vsyncadd (!%p960_p12), %s720_s13, 4294967168  ;;  %p19_p2 = scmp.ge.s32.totalorder %s1323_s16, 4   ;;  %s1491_s18 = smov %s1162_s19 }
 0x51c   : > { %s1492_s19 = smov %s1166_s20  ;;  %s1493_s20 = smov %s1332_s27 }
 0x51d   : > { %s1494_s21 = smov %s1323_s16  ;;  %21 = sbr.rel (!%p19_p2) target bundleno = 6 (0x6), region = 93 }
 0x524   :  { %725 = vsyncpa [#allocation3], 1 }
 0x525   :  { %727 = vsyncpa [#allocation3 + $0x1], 1 }
 0x526   :  { %728 = vsyncpa [#allocation6], 1 }
 0x527   :  { %729 = vsyncpa [#allocation4], 1 }
 0x528   :  { %731 = vsyncpa [#allocation4 + $0x1], 1 }

</bundles_post_ra>
